<compile_context>
chip_gen: v7x
topology: tpu7x:2x2x1
jax: 0.10.0
libtpu: 0.0.40
codegen_flags: <defaults>
</compile_context>

<pallas_src>
import functools
import math

import jax
import jax.numpy as jnp
from jax.experimental import pallas as pl
from jax.experimental.pallas import tpu as pltpu


def _attention_kernel(k_ref, q_ref, wk_ref, bk_ref, wq_ref, bq_ref,
                      wp_ref, bp_ref, out_ref, score_ref,
                      *, n_head, hidden_dim):
    """Fused attention for one batch tile.

    Block shapes (cdt = bf16 compute dtype, accumulation always f32):
      k_ref: (bt, k_len, E) cdt     q_ref: (bt, q_len, E) cdt
      wk_ref / wq_ref: (E, n_head*H) cdt   bk / bq: (1, n_head*H) f32
      wp_ref: (n_head*H, out_dim) cdt      bp: (1, out_dim) f32
      out_ref:   (bt, q_len, out_dim) f32
      score_ref: (n_head, bt, q_len, k_len) f32
    """
    bt, k_len, E = k_ref.shape
    q_len = q_ref.shape[1]
    H = hidden_dim
    out_dim = out_ref.shape[-1]
    cdt = k_ref.dtype
    f32 = jnp.float32

    # ---- Fused projections: ONE MXU matmul each, M = bt*len (amortizes the
    # systolic-array fill), single f32 bias broadcast. ----
    k2d = k_ref[...].reshape(bt * k_len, E)
    q2d = q_ref[...].reshape(bt * q_len, E)
    kx = jnp.dot(k2d, wk_ref[...], preferred_element_type=f32) + bk_ref[...]   # (bt*k_len, NH*H)
    qx = jnp.dot(q2d, wq_ref[...], preferred_element_type=f32) + bq_ref[...]   # (bt*q_len, NH*H)

    wp = wp_ref[...]            # hoisted: grid-invariant weight load
    bp = bp_ref[...]

    # ---- Per-head attention, batched over the whole batch tile. ----
    # NOTE: when H is not a multiple of 128 these lane slices cost a small
    # relayout; for lane-aligned H they are free views.
    out_acc = None
    for h in range(n_head):
        lo = h * H
        kh = kx[:, lo:lo + H].reshape(bt, k_len, H).astype(cdt)   # (bt, k_len, H)
        qh = qx[:, lo:lo + H].reshape(bt, q_len, H).astype(cdt)   # (bt, q_len, H)

        # score = qh @ kh^T, batched over bt (single-batch-dim dot_general).
        s = jnp.einsum('bqd,bkd->bqk', qh, kh,
                       preferred_element_type=f32)                # (bt, q_len, k_len)

        # Numerically-stable softmax over k_len, in f32; divide on the EUP.
        s = s - jnp.max(s, axis=-1, keepdims=True)
        e = jnp.exp(s)
        p = e * pl.reciprocal(jnp.sum(e, axis=-1, keepdims=True), approx=True)

        # One contiguous (bt, q_len, k_len) slab store per head (head-major,
        # matches the PyTorch permute/view ordering).
        score_ref[h] = p.astype(score_ref.dtype)

        # Attended values (batched over bt), then this head's slice of the
        # output projection: concat_h(o_h) @ Wp == sum_h o_h @ Wp[h].
        o = jnp.einsum('bqk,bkd->bqd', p.astype(cdt), kh,
                       preferred_element_type=f32)                # (bt, q_len, H)
        c = jnp.dot(o.reshape(bt * q_len, H).astype(cdt), wp[lo:lo + H, :],
                    preferred_element_type=f32)                   # (bt*q_len, out_dim)
        out_acc = c if out_acc is None else out_acc + c

    # Single output-tile store per grid step.
    out_ref[...] = (out_acc + bp).reshape(bt, q_len, out_dim).astype(out_ref.dtype)


def attention(k, q, w_k, b_k, w_q, b_q, w_proj, b_proj, *,
              n_head=1, hidden_dim=None, score_function='dot_product',
              batch_tile=None, compute_dtype=jnp.bfloat16):
    """Forward pass of the PyTorch `Attention` module (eval mode).

    k: (B, k_len, E) or (B, E);  q: (B, q_len, E) or (B, E)
    w_k / w_q: (n_head*hidden, E), b_k / b_q: (n_head*hidden,)
    w_proj: (out_dim, n_head*hidden), b_proj: (out_dim,)
    Returns (output, score): output (B, q_len, out_dim) f32,
    score (n_head*B, q_len, k_len) f32 — same layout as the PyTorch module.
    """
    if q.ndim == 2:
        q = q[:, None, :]
    if k.ndim == 2:
        k = k[:, None, :]
    B, k_len, E = k.shape
    q_len = q.shape[1]
    if hidden_dim is None:
        hidden_dim = E // n_head
    nh_h = n_head * hidden_dim
    out_dim = w_proj.shape[0]
    f32 = jnp.float32

    # Weight prep (pre-transposed to (in, out) so every hot matmul is x @ W).
    # NOTE: under jit with traced weights this re-transpose/cast happens per
    # call; pre-transpose once at parameter-load time in a real model.
    wk_t = jnp.asarray(w_k, f32).T                 # (E, NH*H)
    wq_t = jnp.asarray(w_q, f32).T                 # (E, NH*H)
    wp_t = jnp.asarray(w_proj, f32).T              # (NH*H, out_dim)
    bk = jnp.asarray(b_k, f32).reshape(1, nh_h)
    bq = jnp.asarray(b_q, f32).reshape(1, nh_h)
    bp = jnp.asarray(b_proj, f32).reshape(1, out_dim)

    if score_function == 'dot_product':
        pass
    elif score_function == 'scaled_dot_product':
        # Fold the 1/sqrt(H) score scale into the query projection (one-time
        # O(E*NH*H) weight scale instead of a per-score VPU pass in-kernel).
        scale = 1.0 / math.sqrt(hidden_dim)
        wq_t = wq_t * scale
        bq = bq * scale
    else:
        # TODO(synk): 'mlp' and 'bi_linear' score functions not implemented.
        raise NotImplementedError(f"score_function={score_function!r}")

    # TODO(synk): nn.Dropout is identity in eval mode / p=0; not implemented.

    # bf16 MXU operands (f32 accumulation in-kernel); biases stay f32.
    k = k.astype(compute_dtype)
    q = q.astype(compute_dtype)
    wk_t = wk_t.astype(compute_dtype)
    wq_t = wq_t.astype(compute_dtype)
    wp_t = wp_t.astype(compute_dtype)

    # ---- Batch-tile sizing: fill a conservative VMEM budget, then cap at
    # ceil(B/2) so the parallel grid axis has >=2 steps (v7x megacore). ----
    itemsize = jnp.dtype(compute_dtype).itemsize
    if batch_tile is None:
        per_b = 2 * itemsize * (k_len + q_len) * E            # k/q tiles (double-buffered)
        per_b += 2 * 4 * q_len * out_dim                       # out tile   (double-buffered)
        per_b += 2 * 4 * n_head * q_len * k_len                # score tile (double-buffered)
        per_b += 4 * (k_len + q_len) * nh_h                    # kx / qx intermediates
        per_b += 4 * q_len * (2 * k_len + hidden_dim + out_dim)  # per-head working set
        budget = 12 * 1024 * 1024                              # safe on v5e/v6e/v7x
        batch_tile = max(1, budget // max(per_b, 1))
    bt = int(max(1, min(batch_tile, B)))
    if B >= 2:
        bt = min(bt, -(-B // 2))      # guarantee >= 2 grid steps
    b_pad = pl.cdiv(B, bt) * bt
    if b_pad != B:
        pads = ((0, b_pad - B), (0, 0), (0, 0))
        k = jnp.pad(k, pads)
        q = jnp.pad(q, pads)

    kernel = functools.partial(_attention_kernel, n_head=n_head,
                               hidden_dim=hidden_dim)

    # Weight/bias specs have constant index maps; Pallas re-uses the resident
    # copies across grid steps. (Single-buffering them via pl.Buffered(1)
    # would reclaim a little more VMEM; skipped here for portability.)
    out, score = pl.pallas_call(
        kernel,
        out_shape=(
            jax.ShapeDtypeStruct((b_pad, q_len, out_dim), f32),
            jax.ShapeDtypeStruct((n_head, b_pad, q_len, k_len), f32),
        ),
        grid_spec=pltpu.PrefetchScalarGridSpec(
            num_scalar_prefetch=0,
            grid=(b_pad // bt,),
            in_specs=[
                pl.BlockSpec((bt, k_len, E), lambda i: (i, 0, 0)),     # k tile
                pl.BlockSpec((bt, q_len, E), lambda i: (i, 0, 0)),     # q tile
                pl.BlockSpec((E, nh_h), lambda i: (0, 0)),             # W_k^T
                pl.BlockSpec((1, nh_h), lambda i: (0, 0)),             # b_k
                pl.BlockSpec((E, nh_h), lambda i: (0, 0)),             # W_q^T (scale folded)
                pl.BlockSpec((1, nh_h), lambda i: (0, 0)),             # b_q   (scale folded)
                pl.BlockSpec((nh_h, out_dim), lambda i: (0, 0)),       # W_proj^T
                pl.BlockSpec((1, out_dim), lambda i: (0, 0)),          # b_proj
            ],
            out_specs=[
                pl.BlockSpec((bt, q_len, out_dim), lambda i: (i, 0, 0)),
                pl.BlockSpec((n_head, bt, q_len, k_len), lambda i: (0, i, 0, 0)),
            ],
        ),
        compiler_params=pltpu.CompilerParams(
            dimension_semantics=("parallel",),      # batches independent -> megacore
            vmem_limit_bytes=40 * 1024 * 1024,      # > default scoped limit, < v7x physical
        ),
    )(k, q, wk_t, bk, wq_t, bq, wp_t, bp)

    out = out[:B]                                                    # (B, q_len, out)
    score = score[:, :B].reshape(n_head * B, q_len, k_len)           # head-major
    return out, score


def _ref_attention(k, q, w_k, b_k, w_q, b_q, w_proj, b_proj, *,
                   n_head, hidden_dim, score_function):
    """Pure-JAX transcription of the PyTorch Attention.forward (f32)."""
    if q.ndim == 2:
        q = q[:, None, :]
    if k.ndim == 2:
        k = k[:, None, :]
    B, k_len, _ = k.shape
    q_len = q.shape[1]
    hp = jax.lax.Precision.HIGHEST
    kx = jnp.einsum('bke,fe->bkf', k, w_k, precision=hp) + b_k
    kx = kx.reshape(B, k_len, n_head, hidden_dim).transpose(2, 0, 1, 3)
    kx = kx.reshape(n_head * B, k_len, hidden_dim)
    qx = jnp.einsum('bqe,fe->bqf', q, w_q, precision=hp) + b_q
    qx = qx.reshape(B, q_len, n_head, hidden_dim).transpose(2, 0, 1, 3)
    qx = qx.reshape(n_head * B, q_len, hidden_dim)
    score = jnp.einsum('bqh,bkh->bqk', qx, kx, precision=hp)
    if score_function == 'scaled_dot_product':
        score = score / math.sqrt(hidden_dim)
    score = jax.nn.softmax(score, axis=-1)
    output = jnp.einsum('bqk,bkh->bqh', score, kx, precision=hp)
    output = jnp.concatenate(jnp.split(output, n_head, axis=0), axis=-1)
    output = jnp.einsum('bqf,of->bqo', output, w_proj, precision=hp) + b_proj
    return output, score


def _make_params(key, embed_dim, n_head, hidden_dim, out_dim):
    nh_h = n_head * hidden_dim
    ks = jax.random.split(key, 6)
    b_in = 1.0 / math.sqrt(embed_dim)
    b_pr = 1.0 / math.sqrt(nh_h)
    w_k = jax.random.uniform(ks[0], (nh_h, embed_dim), jnp.float32, -b_in, b_in)
    b_k = jax.random.uniform(ks[1], (nh_h,), jnp.float32, -b_in, b_in)
    w_q = jax.random.uniform(ks[2], (nh_h, embed_dim), jnp.float32, -b_in, b_in)
    b_q = jax.random.uniform(ks[3], (nh_h,), jnp.float32, -b_in, b_in)
    w_p = jax.random.uniform(ks[4], (out_dim, nh_h), jnp.float32, -b_pr, b_pr)
    b_p = jax.random.uniform(ks[5], (out_dim,), jnp.float32, -b_pr, b_pr)
    return w_k, b_k, w_q, b_q, w_p, b_p


if __name__ == "__main__":
    key = jax.random.PRNGKey(0)
    k0, k1, k2, k3, k4 = jax.random.split(key, 5)

    # Config 1: multi-head dot-product attention (default score function).
    B, k_len, q_len, E = 2, 8, 6, 32
    n_head = 2
    hidden = E // n_head
    out_dim = E
    k_in = jax.random.normal(k0, (B, k_len, E), jnp.float32)
    q_in = jax.random.normal(k1, (B, q_len, E), jnp.float32)
    params = _make_params(k2, E, n_head, hidden, out_dim)

    out, score = attention(k_in, q_in, *params, n_head=n_head,
                           hidden_dim=hidden, score_function='dot_product')
    jax.block_until_ready((out, score))
    out_r, score_r = _ref_attention(k_in, q_in, *params, n_head=n_head,
                                    hidden_dim=hidden,
                                    score_function='dot_product')
    assert out.shape == (B, q_len, out_dim)
    assert score.shape == (n_head * B, q_len, k_len)
    # bf16 MXU operands -> slightly looser tolerance than a pure-f32 pipeline.
    assert jnp.allclose(out, out_r, atol=3e-2, rtol=3e-2), \
        float(jnp.max(jnp.abs(out - out_r)))
    assert jnp.allclose(score, score_r, atol=3e-2, rtol=3e-2), \
        float(jnp.max(jnp.abs(score - score_r)))

    # Config 2: single head, scaled_dot_product, 2-D query (unsqueeze path).
    n_head2, hidden2 = 1, E
    params2 = _make_params(k3, E, n_head2, hidden2, out_dim)
    q2 = jax.random.normal(k4, (B, E), jnp.float32)
    out2, score2 = attention(k_in, q2, *params2, n_head=n_head2,
                             hidden_dim=hidden2,
                             score_function='scaled_dot_product')
    jax.block_until_ready((out2, score2))
    out2_r, score2_r = _ref_attention(k_in, q2, *params2, n_head=n_head2,
                                      hidden_dim=hidden2,
                                      score_function='scaled_dot_product')
    assert out2.shape == (B, 1, out_dim)
    assert score2.shape == (n_head2 * B, 1, k_len)
    assert jnp.allclose(out2, out2_r, atol=3e-2, rtol=3e-2)
    assert jnp.allclose(score2, score2_r, atol=3e-2, rtol=3e-2)

    print("KERNEL_OK")
</pallas_src>

<mosaic_0001>
module attributes {stable_mosaic.version = 11 : i64} {
  func.func @_attention_kernel(%arg0: i32, %arg1: memref<1x8x32xbf16, #tpu.memory_space<vmem>>, %arg2: memref<1x6x32xbf16, #tpu.memory_space<vmem>>, %arg3: memref<32x32xbf16, #tpu.memory_space<vmem>>, %arg4: memref<1x32xf32, #tpu.memory_space<vmem>>, %arg5: memref<32x32xbf16, #tpu.memory_space<vmem>>, %arg6: memref<1x32xf32, #tpu.memory_space<vmem>>, %arg7: memref<32x32xbf16, #tpu.memory_space<vmem>>, %arg8: memref<1x32xf32, #tpu.memory_space<vmem>>, %arg9: memref<1x6x32xf32, #tpu.memory_space<vmem>>, %arg10: memref<2x1x6x8xf32, #tpu.memory_space<vmem>>) attributes {dimension_semantics = [#tpu.dimension_semantics<parallel>], iteration_bounds = array<i64: 2>, scalar_prefetch = 0 : i64, scratch_operands = 0 : i64, tpu.core_type = #tpu.core_type<tc>, window_params = [{transform_indices = @transform_0, window_bounds = array<i64: 1, 8, 32>}, {transform_indices = @transform_1, window_bounds = array<i64: 1, 6, 32>}, {pipeline_mode = #tpu.pipeline_mode<synchronous>, transform_indices = @transform_2, window_bounds = array<i64: 32, 32>}, {pipeline_mode = #tpu.pipeline_mode<synchronous>, transform_indices = @transform_3, window_bounds = array<i64: 1, 32>}, {pipeline_mode = #tpu.pipeline_mode<synchronous>, transform_indices = @transform_4, window_bounds = array<i64: 32, 32>}, {pipeline_mode = #tpu.pipeline_mode<synchronous>, transform_indices = @transform_5, window_bounds = array<i64: 1, 32>}, {pipeline_mode = #tpu.pipeline_mode<synchronous>, transform_indices = @transform_6, window_bounds = array<i64: 32, 32>}, {pipeline_mode = #tpu.pipeline_mode<synchronous>, transform_indices = @transform_7, window_bounds = array<i64: 1, 32>}, {transform_indices = @transform_8, window_bounds = array<i64: 1, 6, 32>}, {transform_indices = @transform_9, window_bounds = array<i64: 2, 1, 6, 8>}]} {
    %c0 = arith.constant 0 : index
    %c0_0 = arith.constant 0 : index
    %c0_1 = arith.constant 0 : index
    %0 = vector.load %arg1[%c0, %c0_0, %c0_1] : memref<1x8x32xbf16, #tpu.memory_space<vmem>>, vector<1x8x32xbf16>
    %1 = vector.shape_cast %0 : vector<1x8x32xbf16> to vector<8x32xbf16>
    %c0_2 = arith.constant 0 : index
    %c0_3 = arith.constant 0 : index
    %c0_4 = arith.constant 0 : index
    %2 = vector.load %arg2[%c0_2, %c0_3, %c0_4] : memref<1x6x32xbf16, #tpu.memory_space<vmem>>, vector<1x6x32xbf16>
    %3 = vector.shape_cast %2 : vector<1x6x32xbf16> to vector<6x32xbf16>
    %c0_5 = arith.constant 0 : index
    %c0_6 = arith.constant 0 : index
    %4 = vector.load %arg3[%c0_5, %c0_6] : memref<32x32xbf16, #tpu.memory_space<vmem>>, vector<32x32xbf16>
    %cst = arith.constant dense<0.000000e+00> : vector<8x32xf32>
    %5 = tpu.matmul %1, %4, %cst {dimension_numbers = #tpu.dot_dimension_numbers<[1], [0], [0], [1], [0, 0, 1, 1], [], []>} : vector<8x32xbf16>, vector<32x32xbf16>, vector<8x32xf32> -> vector<8x32xf32>
    %c0_7 = arith.constant 0 : index
    %c0_8 = arith.constant 0 : index
    %6 = vector.load %arg4[%c0_7, %c0_8] : memref<1x32xf32, #tpu.memory_space<vmem>>, vector<1x32xf32>
    %7 = vector.broadcast %6 : vector<1x32xf32> to vector<8x32xf32>
    %8 = arith.addf %5, %7 : vector<8x32xf32>
    %c0_9 = arith.constant 0 : index
    %c0_10 = arith.constant 0 : index
    %9 = vector.load %arg5[%c0_9, %c0_10] : memref<32x32xbf16, #tpu.memory_space<vmem>>, vector<32x32xbf16>
    %cst_11 = arith.constant dense<0.000000e+00> : vector<6x32xf32>
    %10 = tpu.matmul %3, %9, %cst_11 {dimension_numbers = #tpu.dot_dimension_numbers<[1], [0], [0], [1], [0, 0, 1, 1], [], []>} : vector<6x32xbf16>, vector<32x32xbf16>, vector<6x32xf32> -> vector<6x32xf32>
    %c0_12 = arith.constant 0 : index
    %c0_13 = arith.constant 0 : index
    %11 = vector.load %arg6[%c0_12, %c0_13] : memref<1x32xf32, #tpu.memory_space<vmem>>, vector<1x32xf32>
    %12 = vector.broadcast %11 : vector<1x32xf32> to vector<6x32xf32>
    %13 = arith.addf %10, %12 : vector<6x32xf32>
    %c0_14 = arith.constant 0 : index
    %c0_15 = arith.constant 0 : index
    %14 = vector.load %arg7[%c0_14, %c0_15] : memref<32x32xbf16, #tpu.memory_space<vmem>>, vector<32x32xbf16>
    %c0_16 = arith.constant 0 : index
    %c0_17 = arith.constant 0 : index
    %15 = vector.load %arg8[%c0_16, %c0_17] : memref<1x32xf32, #tpu.memory_space<vmem>>, vector<1x32xf32>
    %16 = vector.extract_strided_slice %8 {offsets = [0, 0], sizes = [8, 16], strides = [1, 1]} : vector<8x32xf32> to vector<8x16xf32>
    %17 = vector.shape_cast %16 : vector<8x16xf32> to vector<1x8x16xf32>
    %18 = arith.truncf %17 : vector<1x8x16xf32> to vector<1x8x16xbf16>
    %19 = vector.extract_strided_slice %13 {offsets = [0, 0], sizes = [6, 16], strides = [1, 1]} : vector<6x32xf32> to vector<6x16xf32>
    %20 = vector.shape_cast %19 : vector<6x16xf32> to vector<1x6x16xf32>
    %21 = arith.truncf %20 : vector<1x6x16xf32> to vector<1x6x16xbf16>
    "tpu.trace_start"() <{level = 10 : i32, message = "bqd,bkd->bqk"}> : () -> ()
    %cst_18 = arith.constant dense<0.000000e+00> : vector<1x6x8xf32>
    %22 = tpu.matmul %21, %18, %cst_18 {dimension_numbers = #tpu.dot_dimension_numbers<[2], [2], [1], [1], [0, 0, 0, 1, 1, 1], [0], [0]>} : vector<1x6x16xbf16>, vector<1x8x16xbf16>, vector<1x6x8xf32> -> vector<1x6x8xf32>
    "tpu.trace_stop"() : () -> ()
    %cst_19 = arith.constant dense<0xFF800000> : vector<1x6xf32>
    %23 = vector.multi_reduction <maximumf>, %22, %cst_19 [2] : vector<1x6x8xf32> to vector<1x6xf32>
    %24 = vector.shape_cast %23 : vector<1x6xf32> to vector<1x6x1xf32>
    %25 = vector.broadcast %24 : vector<1x6x1xf32> to vector<1x6x8xf32>
    %26 = arith.subf %22, %25 : vector<1x6x8xf32>
    %27 = math.exp %26 : vector<1x6x8xf32>
    %cst_20 = arith.constant dense<0.000000e+00> : vector<1x6xf32>
    %28 = vector.multi_reduction <add>, %27, %cst_20 [2] : vector<1x6x8xf32> to vector<1x6xf32>
    %29 = vector.shape_cast %28 : vector<1x6xf32> to vector<1x6x1xf32>
    %30 = tpu.reciprocal %29 {approx = true} : vector<1x6x1xf32> -> vector<1x6x1xf32>
    %31 = vector.broadcast %30 : vector<1x6x1xf32> to vector<1x6x8xf32>
    %32 = arith.mulf %27, %31 : vector<1x6x8xf32>
    %c0_21 = arith.constant 0 : index
    %c0_22 = arith.constant 0 : index
    %c0_23 = arith.constant 0 : index
    %c0_24 = arith.constant 0 : index
    %33 = vector.load %arg10[%c0_21, %c0_22, %c0_23, %c0_24] : memref<2x1x6x8xf32, #tpu.memory_space<vmem>>, vector<1x1x6x8xf32>
    %34 = vector.shape_cast %33 : vector<1x1x6x8xf32> to vector<1x6x8xf32>
    %35 = vector.shape_cast %32 : vector<1x6x8xf32> to vector<1x1x6x8xf32>
    tpu.vector_store %arg10[%c0_21, %c0_22, %c0_23, %c0_24], %35 {strides = array<i32>} : memref<2x1x6x8xf32, #tpu.memory_space<vmem>>, vector<1x1x6x8xf32>,
    %36 = arith.truncf %32 : vector<1x6x8xf32> to vector<1x6x8xbf16>
    "tpu.trace_start"() <{level = 10 : i32, message = "bqk,bkd->bqd"}> : () -> ()
    %cst_25 = arith.constant dense<0.000000e+00> : vector<1x6x16xf32>
    %37 = tpu.matmul %36, %18, %cst_25 {dimension_numbers = #tpu.dot_dimension_numbers<[2], [1], [1], [2], [0, 0, 0, 1, 1, 2], [0], [0]>} : vector<1x6x8xbf16>, vector<1x8x16xbf16>, vector<1x6x16xf32> -> vector<1x6x16xf32>
    "tpu.trace_stop"() : () -> ()
    %38 = vector.shape_cast %37 : vector<1x6x16xf32> to vector<6x16xf32>
    %39 = arith.truncf %38 : vector<6x16xf32> to vector<6x16xbf16>
    %40 = vector.extract_strided_slice %14 {offsets = [0, 0], sizes = [16, 32], strides = [1, 1]} : vector<32x32xbf16> to vector<16x32xbf16>
    %cst_26 = arith.constant dense<0.000000e+00> : vector<6x32xf32>
    %41 = tpu.matmul %39, %40, %cst_26 {dimension_numbers = #tpu.dot_dimension_numbers<[1], [0], [0], [1], [0, 0, 1, 1], [], []>} : vector<6x16xbf16>, vector<16x32xbf16>, vector<6x32xf32> -> vector<6x32xf32>
    %42 = vector.extract_strided_slice %8 {offsets = [0, 16], sizes = [8, 16], strides = [1, 1]} : vector<8x32xf32> to vector<8x16xf32>
    %43 = vector.shape_cast %42 : vector<8x16xf32> to vector<1x8x16xf32>
    %44 = arith.truncf %43 : vector<1x8x16xf32> to vector<1x8x16xbf16>
    %45 = vector.extract_strided_slice %13 {offsets = [0, 16], sizes = [6, 16], strides = [1, 1]} : vector<6x32xf32> to vector<6x16xf32>
    %46 = vector.shape_cast %45 : vector<6x16xf32> to vector<1x6x16xf32>
    %47 = arith.truncf %46 : vector<1x6x16xf32> to vector<1x6x16xbf16>
    "tpu.trace_start"() <{level = 10 : i32, message = "bqd,bkd->bqk"}> : () -> ()
    %cst_27 = arith.constant dense<0.000000e+00> : vector<1x6x8xf32>
    %48 = tpu.matmul %47, %44, %cst_27 {dimension_numbers = #tpu.dot_dimension_numbers<[2], [2], [1], [1], [0, 0, 0, 1, 1, 1], [0], [0]>} : vector<1x6x16xbf16>, vector<1x8x16xbf16>, vector<1x6x8xf32> -> vector<1x6x8xf32>
    "tpu.trace_stop"() : () -> ()
    %cst_28 = arith.constant dense<0xFF800000> : vector<1x6xf32>
    %49 = vector.multi_reduction <maximumf>, %48, %cst_28 [2] : vector<1x6x8xf32> to vector<1x6xf32>
    %50 = vector.shape_cast %49 : vector<1x6xf32> to vector<1x6x1xf32>
    %51 = vector.broadcast %50 : vector<1x6x1xf32> to vector<1x6x8xf32>
    %52 = arith.subf %48, %51 : vector<1x6x8xf32>
    %53 = math.exp %52 : vector<1x6x8xf32>
    %cst_29 = arith.constant dense<0.000000e+00> : vector<1x6xf32>
    %54 = vector.multi_reduction <add>, %53, %cst_29 [2] : vector<1x6x8xf32> to vector<1x6xf32>
    %55 = vector.shape_cast %54 : vector<1x6xf32> to vector<1x6x1xf32>
    %56 = tpu.reciprocal %55 {approx = true} : vector<1x6x1xf32> -> vector<1x6x1xf32>
    %57 = vector.broadcast %56 : vector<1x6x1xf32> to vector<1x6x8xf32>
    %58 = arith.mulf %53, %57 : vector<1x6x8xf32>
    %c1 = arith.constant 1 : index
    %c0_30 = arith.constant 0 : index
    %c0_31 = arith.constant 0 : index
    %c0_32 = arith.constant 0 : index
    %59 = vector.load %arg10[%c1, %c0_30, %c0_31, %c0_32] : memref<2x1x6x8xf32, #tpu.memory_space<vmem>>, vector<1x1x6x8xf32>
    %60 = vector.shape_cast %59 : vector<1x1x6x8xf32> to vector<1x6x8xf32>
    %61 = vector.shape_cast %58 : vector<1x6x8xf32> to vector<1x1x6x8xf32>
    tpu.vector_store %arg10[%c1, %c0_30, %c0_31, %c0_32], %61 {strides = array<i32>} : memref<2x1x6x8xf32, #tpu.memory_space<vmem>>, vector<1x1x6x8xf32>,
    %62 = arith.truncf %58 : vector<1x6x8xf32> to vector<1x6x8xbf16>
    "tpu.trace_start"() <{level = 10 : i32, message = "bqk,bkd->bqd"}> : () -> ()
    %cst_33 = arith.constant dense<0.000000e+00> : vector<1x6x16xf32>
    %63 = tpu.matmul %62, %44, %cst_33 {dimension_numbers = #tpu.dot_dimension_numbers<[2], [1], [1], [2], [0, 0, 0, 1, 1, 2], [0], [0]>} : vector<1x6x8xbf16>, vector<1x8x16xbf16>, vector<1x6x16xf32> -> vector<1x6x16xf32>
    "tpu.trace_stop"() : () -> ()
    %64 = vector.shape_cast %63 : vector<1x6x16xf32> to vector<6x16xf32>
    %65 = arith.truncf %64 : vector<6x16xf32> to vector<6x16xbf16>
    %66 = vector.extract_strided_slice %14 {offsets = [16, 0], sizes = [16, 32], strides = [1, 1]} : vector<32x32xbf16> to vector<16x32xbf16>
    %cst_34 = arith.constant dense<0.000000e+00> : vector<6x32xf32>
    %67 = tpu.matmul %65, %66, %cst_34 {dimension_numbers = #tpu.dot_dimension_numbers<[1], [0], [0], [1], [0, 0, 1, 1], [], []>} : vector<6x16xbf16>, vector<16x32xbf16>, vector<6x32xf32> -> vector<6x32xf32>
    %68 = arith.addf %41, %67 : vector<6x32xf32>
    %69 = vector.broadcast %15 : vector<1x32xf32> to vector<6x32xf32>
    %70 = arith.addf %68, %69 : vector<6x32xf32>
    %71 = vector.shape_cast %70 : vector<6x32xf32> to vector<1x6x32xf32>
    %c0_35 = arith.constant 0 : index
    %c0_36 = arith.constant 0 : index
    %c0_37 = arith.constant 0 : index
    %72 = vector.load %arg9[%c0_35, %c0_36, %c0_37] : memref<1x6x32xf32, #tpu.memory_space<vmem>>, vector<1x6x32xf32>
    tpu.vector_store %arg9[%c0_35, %c0_36, %c0_37], %71 {strides = array<i32>} : memref<1x6x32xf32, #tpu.memory_space<vmem>>, vector<1x6x32xf32>,
    return
  }
  func.func @transform_0(%arg0: i32) -> (i32, i32, i32) {
    %c0_i32 = arith.constant 0 : i32
    %c0_i32_0 = arith.constant 0 : i32
    %c0_i32_1 = arith.constant 0 : i32
    return %arg0, %c0_i32, %c0_i32_0 : i32, i32, i32
  }
  func.func @transform_1(%arg0: i32) -> (i32, i32, i32) {
    %c0_i32 = arith.constant 0 : i32
    %c0_i32_0 = arith.constant 0 : i32
    %c0_i32_1 = arith.constant 0 : i32
    return %arg0, %c0_i32, %c0_i32_0 : i32, i32, i32
  }
  func.func @transform_2(%arg0: i32) -> (i32, i32) {
    %c0_i32 = arith.constant 0 : i32
    %c0_i32_0 = arith.constant 0 : i32
    %c0_i32_1 = arith.constant 0 : i32
    return %c0_i32, %c0_i32_0 : i32, i32
  }
  func.func @transform_3(%arg0: i32) -> (i32, i32) {
    %c0_i32 = arith.constant 0 : i32
    %c0_i32_0 = arith.constant 0 : i32
    %c0_i32_1 = arith.constant 0 : i32
    return %c0_i32, %c0_i32_0 : i32, i32
  }
  func.func @transform_4(%arg0: i32) -> (i32, i32) {
    %c0_i32 = arith.constant 0 : i32
    %c0_i32_0 = arith.constant 0 : i32
    %c0_i32_1 = arith.constant 0 : i32
    return %c0_i32, %c0_i32_0 : i32, i32
  }
  func.func @transform_5(%arg0: i32) -> (i32, i32) {
    %c0_i32 = arith.constant 0 : i32
    %c0_i32_0 = arith.constant 0 : i32
    %c0_i32_1 = arith.constant 0 : i32
    return %c0_i32, %c0_i32_0 : i32, i32
  }
  func.func @transform_6(%arg0: i32) -> (i32, i32) {
    %c0_i32 = arith.constant 0 : i32
    %c0_i32_0 = arith.constant 0 : i32
    %c0_i32_1 = arith.constant 0 : i32
    return %c0_i32, %c0_i32_0 : i32, i32
  }
  func.func @transform_7(%arg0: i32) -> (i32, i32) {
    %c0_i32 = arith.constant 0 : i32
    %c0_i32_0 = arith.constant 0 : i32
    %c0_i32_1 = arith.constant 0 : i32
    return %c0_i32, %c0_i32_0 : i32, i32
  }
  func.func @transform_8(%arg0: i32) -> (i32, i32, i32) {
    %c0_i32 = arith.constant 0 : i32
    %c0_i32_0 = arith.constant 0 : i32
    %c0_i32_1 = arith.constant 0 : i32
    return %arg0, %c0_i32, %c0_i32_0 : i32, i32, i32
  }
  func.func @transform_9(%arg0: i32) -> (i32, i32, i32, i32) {
    %c0_i32 = arith.constant 0 : i32
    %c0_i32_0 = arith.constant 0 : i32
    %c0_i32_1 = arith.constant 0 : i32
    %c0_i32_2 = arith.constant 0 : i32
    return %c0_i32, %arg0, %c0_i32_0, %c0_i32_1 : i32, i32, i32, i32
  }
}

</mosaic_0001>

<bundles_post_ra>
// kernel: tpu_custom_call.1
= control target key start
LH: loop header
LB: loop body
LE: loop exit
PB: predicated region body
PF: predicated region fallthrough
CT: control target
= control target key end

     0   :  { %s1758_s0 = inlined_call_operand.hbm [shape: bf16[2,8,32], index: 0, kind: input, shape index: {}]   ;;  %s1759_s1 = inlined_call_operand.vmem [shape: bf16[2,6,32], index: 1, kind: input, shape index: {}]   ;;  %s1760_s2 = inlined_call_operand.vmem [shape: bf16[32,32], index: 2, kind: input, shape index: {}]   ;;  %s1761_s3 = inlined_call_operand.hbm [shape: f32[1,32], index: 3, kind: input, shape index: {}]   ;;  %s1762_s4 = inlined_call_operand.hbm [shape: bf16[32,32], index: 4, kind: input, shape index: {}]   ;;  %s1763_s5 = inlined_call_operand.hbm [shape: f32[1,32], index: 5, kind: input, shape index: {}]   ;;  %s1764_s6 = inlined_call_operand.vmem [shape: bf16[32,32], index: 6, kind: input, shape index: {}]   ;;  %s1765_s7 = inlined_call_operand.vmem [shape: f32[1,32], index: 7, kind: input, shape index: {}]   ;;  %s1766_s8 = inlined_call_operand.vmem [shape: f32[2,6,32], index: 8, kind: output, shape index: {0}]   ;;  %s1767_s9 = inlined_call_operand.vmem [shape: f32[2,2,6,8], index: 9, kind: output, shape index: {1}]  }
   0x1   :  { %1771 = sst [smem:[#allocation13_spill]] %s1761_s3 }
   0x2   :  { %15 = vsyncpa [#allocation3], 0 }
   0x3   :  { %17 = vsyncpa [#allocation3 + $0x1], 0 }
   0x4   :  { %18 = vsyncpa [#allocation5], 0 }
   0x5   :  { %19 = vsyncpa [#allocation8], 0  ;;  %s1476_s30 = smov 0   ;;  %s1478_s10 = smov 0  }
   0x6   :  { %s1480_s11 = smov 0   ;;  %s1482_s12 = smov 0  }
   0x7 LB: > { %s1495_s13 = sadd.s32 4294967295, %s1415_s12   ;;  %p45_p0 = scmp.ne.s32.totalorder %s1407_s10, %s1403_s30  ;;  %s1415_s12 = sphi %s1482_s12, %s1789_s12   ;;  %s1411_s11 = sphi %s1480_s11, %s1788_s11   ;;  %s1407_s10 = sphi %s1478_s10, %s1787_s10   ;;  %s1403_s30 = sphi %s1476_s30, %s1786_s30  }
   0x8   : > { %p1768_p1 = scmp.eq.s32.totalorder %s1495_s13, 0  ;;  %p1063_p3 = scmp.ge.s32.totalorder %s1415_s12, 1 }
   0x9   : > { %p260_p4 = scmp.lt.s32.totalorder %s1415_s12, 3  ;;  %s1417_s16 = smov [#allocation4]  }
   0xa   : > { %p1504_p5 = por %p1768_p1, %p45_p0  ;;  %s276_s17 = sshll.u32 %s1417_s16, 4  ;;  %s277_s17 = int_to_ptr.vmem [resolvable:$true] %s276_s17 }
   0xb   : > { %p1508_p6 = pnand %p1063_p3, %p260_p4  ;;  %s1418_s19 = smov [#allocation6]  }
   0xc   : > { %s1772_s14 = scalar_select %p1504_p5, 1, 0 }
   0xd   : > { %s1773_s15 = scalar_select %p1508_p6, 1, 0 }
   0xe   : > { %p1184_p7 = pneg %p1508_p6  ;;  %s286_s20 = sshll.u32 %s1418_s19, 4  ;;  %s1520_s20 = int_to_ptr.vmem [resolvable:$true] %s286_s20 }
   0xf   : > { %s1775_s3 = sld [smem:[#allocation13_spill]] }
  0x10   : > { %p1516_p8 = pnand %p1184_p7, %p1768_p1 }
  0x12   : > { %p1530_p10 = pneg %p1516_p8 }
  0x15   : > { %s1259_s23 = scalar_lea.hbm %s1775_s3, 16 }
  0x16   : > { %p1260_p9 = scmp.ne.s32.totalorder %s1775_s3, %s1259_s23  ;;  %p1266_p13 = scmp.lt.u32.totalorder %s1259_s23, %s1775_s3 }
  0x18   : > { %p1262_p11 = pnand %p1530_p10, %p1260_p9 }
  0x1a   : > { %p1263_p12 = pneg %p1262_p11 }
  0x1c   : > { %p1268_p0 = pnand %p1266_p13, %p1263_p12 }
  0x1e   : > { %1271 = shalt.err (!%p1268_p0)
}
  0x1f   : > { %s1272_s29 = scalar_lea.vmem %s277_s17, 16  ;;  %s1279_s30 = scalar_lea.vmem %s277_s17, 32 }
  0x20   : > { %p1273_p3 = scmp.ne.s32.totalorder %s277_s17, %s1272_s29  ;;  %p1280_p1 = scmp.lt.s32.totalorder %s277_s17, %s277_s17 }
  0x21   : > { %p1281_p2 = scmp.lt.s32.totalorder %s1279_s30, %s1272_s29 }
  0x22   : > { %p1275_p4 = pnand %p1273_p3, %p1530_p10 }
  0x23   : > { %p1282_p5 = por %p1281_p2, %p1280_p1 }
  0x24   : > { %p1276_p7 = pneg %p1275_p4 }
  0x26   : > { %p1283_p6 = pnand %p1282_p5, %p1276_p7 }
  0x28   : > { %1286 = shalt.err (!%p1283_p6)
}
  0x29   : > { %1187 = dma.hbm_to_vmem [thread:$0]  (!%p1516_p8), %s1775_s3, 16, %s277_s17, [#allocation5]  }
  0x2a   : > { %s1287_s23 = scalar_lea.hbm %s1762_s4, 256 }
  0x2b   : > { %p1288_p9 = scmp.ne.s32.totalorder %s1762_s4, %s1287_s23  ;;  %p1294_p2 = scmp.lt.u32.totalorder %s1287_s23, %s1762_s4 }
  0x2d   : > { %p1290_p11 = pnand %p1288_p9, %p1530_p10 }
  0x2f   : > { %p1291_p1 = pneg %p1290_p11 }
  0x31   : > { %p1296_p5 = pnand %p1294_p2, %p1291_p1 }
  0x33   : > { %1299 = shalt.err (!%p1296_p5)
}
  0x34   : > { %s1300_s17 = scalar_lea.vmem %s1520_s20, 256  ;;  %p1308_p0 = scmp.lt.s32.totalorder %s1520_s20, %s1520_s20 }
  0x35   : > { %p1301_p6 = scmp.ne.s32.totalorder %s1520_s20, %s1300_s17  ;;  %p1309_p3 = scmp.lt.s32.totalorder %s1300_s17, %s1300_s17 }
  0x37   : > { %p1303_p12 = pnand %p1301_p6, %p1530_p10  ;;  %p1310_p4 = por %p1309_p3, %p1308_p0 }
  0x39   : > { %p1304_p13 = pneg %p1303_p12 }
  0x3b   : > { %p1311_p7 = pnand %p1310_p4, %p1304_p13 }
  0x3d   : > { %1314 = shalt.err (!%p1311_p7)
}
  0x3e   : > { %s1419_s29 = smov 64   ;;  %s1420_s30 = smov 4  }
  0x3f   : > { %1190 = dma.hbm_to_vmem [thread:$0]  (!%p1516_p8), %s1762_s4, 256, %s1520_s20, [#allocation5], %s1419_s29, %s1419_s29, %s1420_s30  }
  0x40   : > { %s1421_s21 = smov [#allocation7]   ;;  %s1315_s25 = scalar_lea.hbm %s1763_s5, 16 }
  0x41   : > { %s300_s22 = sshll.u32 %s1421_s21, 4  ;;  %p1316_p9 = scmp.ne.s32.totalorder %s1763_s5, %s1315_s25  ;;  %s301_s22 = int_to_ptr.vmem [resolvable:$true] %s300_s22 }
  0x42   : > { %p1322_p2 = scmp.lt.u32.totalorder %s1315_s25, %s1763_s5 }
  0x43   : > { %p1318_p11 = pnand %p1316_p9, %p1530_p10 }
  0x45   : > { %p1319_p1 = pneg %p1318_p11 }
  0x47   : > { %p1324_p5 = pnand %p1322_p2, %p1319_p1 }
  0x49   : > { %1327 = shalt.err (!%p1324_p5)
}
  0x4a   : > { %s1328_s20 = scalar_lea.vmem %s301_s22, 16  ;;  %s1335_s29 = scalar_lea.vmem %s301_s22, 32 }
  0x4b   : > { %p1329_p6 = scmp.ne.s32.totalorder %s301_s22, %s1328_s20  ;;  %p1336_p0 = scmp.lt.s32.totalorder %s301_s22, %s301_s22 }
  0x4c   : > { %p1337_p3 = scmp.lt.s32.totalorder %s1335_s29, %s1328_s20 }
  0x4d   : > { %p1331_p12 = pnand %p1329_p6, %p1530_p10 }
  0x4e   : > { %p1338_p4 = por %p1337_p3, %p1336_p0 }
  0x4f   : > { %p1332_p13 = pneg %p1331_p12 }
  0x51   : > { %p1339_p7 = pnand %p1338_p4, %p1332_p13 }
  0x53   : > { %1342 = shalt.err (!%p1339_p7)
}
  0x54   : > { %1193 = dma.hbm_to_vmem [thread:$0]  (!%p1516_p8), %s1763_s5, 16, %s301_s22, [#allocation8]  }
  0x55   : > { %s1588_s3 = sadd.s32 1, %s1415_s12   ;;  %s32_s26 = sadd.s32 1, %s1411_s11 }
  0x56   : > { %s29_s18 = ssub.s32 %s1415_s12, %s1588_s3  ;;  %p39_p10 = scmp.ne.s32.totalorder %s1411_s11, %s1407_s10 }
  0x57   : > { %p30_p9 = scmp.eq.s32.totalorder %s29_s18, 0  ;;  %p40_p11 = scmp.eq.s32.totalorder %s1415_s12, 0 }
  0x58   : > { %p1777_p1 = scmp.eq.s32.totalorder %s1495_s13, 1  ;;  %p1201_p5 = scmp.lt.s32.totalorder %s1415_s12, 2 }
  0x59   : > { %s1604_s21 = scalar_select %p30_p9, %s1411_s11, %s32_s26  }
  0x5a   : > { %p1598_p2 = por %p1777_p1, %p39_p10  ;;  %p41_p6 = por %p40_p11, %p39_p10 }
  0x5b   : > { %s317_s23 = sand.u32 1, %s1411_s11   ;;  %s1069_s22 = sshll.u32 %s1415_s12, 6 }
  0x5c   : > { %s1068_s24 = sshll.u32 %s317_s23, 2  ;;  %s1611_s28 = scalar_lea.hbm %s1758_s0, %s1069_s22 }
  0x5d   : > { %s321_s17 = scalar_lea.vmem [#allocation2], %s1068_s24  ;;  %p1615_p8 = pnand %p1201_p5, %p41_p6 }
  0x5e   : > { %s328_s20 = sshll.u32 %s321_s17, 4  ;;  %s318_s12 = scalar_lea.sflag [#allocation3], %s317_s23  ;;  %s1613_s20 = int_to_ptr.vmem [resolvable:$true] %s328_s20 }
  0x5f   : > { %s1343_s30 = scalar_lea.hbm %s1611_s28, 64  ;;  %p1345_p13 = pneg %p1615_p8 }
  0x60   : > { %p1344_p12 = scmp.ne.s32.totalorder %s1611_s28, %s1343_s30  ;;  %s1348_s18 = scalar_lea.hbm %s1758_s0, 128 }
  0x61   : > { %p1349_p4 = scmp.lt.u32.totalorder %s1611_s28, %s1758_s0  ;;  %p1350_p7 = scmp.lt.u32.totalorder %s1348_s18, %s1343_s30 }
  0x62   : > { %p1346_p0 = pnand %p1345_p13, %p1344_p12  ;;  %p1352_p9 = scmp.lt.u32.totalorder %s1343_s30, %s1611_s28 }
  0x63   : > { %p1351_p10 = por %p1350_p7, %p1349_p4 }
  0x64   : > { %p1347_p3 = pneg %p1346_p0 }
  0x65   : > { %p1353_p11 = por %p1352_p9, %p1351_p10 }
  0x67   : > { %p1354_p1 = pnand %p1353_p11, %p1347_p3 }
  0x69   : > { %1357 = shalt.err (!%p1354_p1)
}
  0x6a   : > { %s1358_s23 = scalar_lea.vmem %s1613_s20, 64  ;;  %s1422_s25 = smov [#allocation2]  }
  0x6b   : > { %p1359_p5 = scmp.ne.s32.totalorder %s1613_s20, %s1358_s23  ;;  %s1363_s27 = sshll.u32 %s1422_s25, 4  ;;  %s1364_s27 = int_to_ptr.vmem [resolvable:$false] %s1363_s27 }
  0x6c   : > { %s1365_s17 = scalar_lea.vmem %s1364_s27, 128  ;;  %p1366_p0 = scmp.lt.s32.totalorder %s1613_s20, %s1364_s27 }
  0x6d   : > { %p1361_p6 = pnand %p1359_p5, %p1345_p13  ;;  %p1367_p4 = scmp.lt.s32.totalorder %s1365_s17, %s1358_s23 }
  0x6f   : > { %p1362_p12 = pneg %p1361_p6  ;;  %p1368_p7 = por %p1367_p4, %p1366_p0 }
  0x71   : > { %p1369_p10 = pnand %p1368_p7, %p1362_p12 }
  0x73   : > { %1372 = shalt.err (!%p1369_p10)
}
  0x74   : > { %1197 = dma.hbm_to_vmem [thread:$0]  (!%p1615_p8), %s1611_s28, 64, %s1613_s20, %s318_s12  }
  0x75   : > { %p1780_p3 = scmp.ne.s32.totalorder %s1773_s15, 0 }
  0x76   : > { %s1647_s30 = sand.u32 (!%p1780_p3), 1, %s1407_s10   ;;  %p1781_p13 = scmp.ne.s32.totalorder (!%p1780_p3), %s1772_s14, 0 }
  0x77   : > { %344 = sbr.rel (%p1780_p3) target bundleno = 1442 (0x5a2), region = 52  ;;  %s1071_s16 = sshll.u32 (!%p1780_p3), %s1647_s30, 2 }
  0x78   : > { %s347_s26 = scalar_lea.sflag (!%p1780_p3), [#allocation3], %s1647_s30  ;;  %s350_s18 = scalar_lea.vmem (!%p1780_p3), [#allocation2], %s1071_s16 }
  0x7e   : > { %1390 = dma.done.wait (%p1781_p13), %s347_s26, 64  }
  0x7f   : > { %1392 = vsyncadd (%p1781_p13), %s347_s26, 4294967232  ;;  %p1782_p9 = scmp.eq.s32.totalorder %s1495_s13, 0 }
  0x81   : > { %1394 = dma.done.wait (%p1782_p9), [#allocation5], 272   ;;  %p1783_p8 = pmov %p1782_p9 }
  0x83   : > { %1396 = vsyncadd (%p1783_p8), [#allocation5], 4294967024  ;;  %p1784_p11 = pmov %p1783_p8 }
  0x84   : > { %p1785_p1 = pmov %p1783_p8 }
  0x85   : > { %1398 = dma.done.wait (%p1784_p11), [#allocation8], 16  }
  0x86   : > { %1400 = vsyncadd (%p1785_p1), [#allocation8], 4294967280  ;;  %v1423_v0 = vmov 0.0   ;;  %p404_p5 = scmp.lt.s32.totalorder %s1495_s13, 1  ;;  %vm1424_vm0 = vmmov 0   ;;  %v1245_v1 = vld [vmem:[%s1760_s2] sm:$0xff]  }
  0x87   : > { %1118 = vmatprep.subr.bf16.mxu0 %v1423_v0  ;;  %1126 = vmatprep.subr.bf16.mxu1 %v1423_v0  ;;  %v1246_v2 = vld [vmem:[%s1760_s2 + $0x8] sm:$0xff]   ;;  %v1248_v4 = vld [vmem:[#allocation6 + $0x8] sm:$0xff]   ;;  %v413_v5 = vld [vmem:[%s350_s18] sm:$0xf]  ;;  %vm438_vm1 = vcmask 261120   ;;  %vm555_vm2 = vcmask 130048  }
  0x88   : > { %1122 = vmatprep.mubr.msk.bf16.mxu0 %vm1424_vm0, %v1423_v0  ;;  %1130 = vmatprep.mubr.msk.bf16.mxu1 %vm1424_vm0, %v1423_v0  ;;  %s1671_s14 = scalar_select %p404_p5, %s1495_s13, 1  ;;  %v1247_v3 = vld [vmem:[#allocation6] sm:$0xff]   ;;  %v1078_v7 = vld [vmem:[#allocation4] ss:$0 sm:$0xff]  ;;  %v1082_v9 = vld [vmem:[#allocation7] ss:$0 sm:$0xff] }
  0x89   : > { %1119 = vmatpush3.bf16.msra.mxu0 %v1245_v1  ;;  %1127 = vmatpush3.bf16.msra.mxu1 %v1247_v3  ;;  %vm620_vm3 = vcmask 1043456   ;;  %s1425_s25 = smov 112   ;;  %vm602_vm4 = vcmask 62464   ;;  %s1075_s27 = sshll.u32 %s1647_s30, 4  ;;  %vm616_vm5 = vcmask 64512   ;;  %v1250_v51 = vld [vmem:[%s1764_s6 + $0x8] sm:$0xff]  }
  0x8a   : > { %s1076_s12 = sshll.u32 %s1671_s14, 2  ;;  %1120 = vmatprep.subr.bf16.mxu0 %v1423_v0  ;;  %1128 = vmatprep.subr.bf16.mxu1 %v1423_v0  ;;  %s1708_s17 = scalar_lea.vmem [#allocation9], %s1075_s27  ;;  %v1249_v55 = vld [vmem:[%s1764_s6] sm:$0xff]   ;;  %vm881_vm6 = vcmask 259072  }
  0x8b   : > { %s407_s23 = scalar_lea.vmem %s1759_s1, %s1076_s12  ;;  %s1077_s15 = sshll.u32 %s1671_s14, 3 }
  0x8c   : > { %v414_v6 = vld [vmem:[%s407_s23] sm:$0x7]  ;;  %s411_s24 = scalar_lea.vmem %s1766_s8, %s1077_s15  ;;  %s1097_s14 = sshll.u32 (%p1598_p2), %s1495_s13, 3 }
  0x8d   : > { %1121 = vmatpush3.bf16.msra.mxu0 %v1246_v2  ;;  %1129 = vmatpush3.bf16.msra.mxu1 %v1248_v4 }
  0x8e   : > { %1134 = vmatprep.subr.bf16.mxu0 %v1423_v0  ;;  %1140 = vmatprep.subr.bf16.mxu1 %v1423_v0 }
  0x90   : > { %1123 = vmatmul.mubr.msk.bf16.vlgmr.msra.gmra.mrb[0].mxu0 %vm438_vm1, %v413_v5  ;;  %1131 = vmatmul.mubr.msk.bf16.vlgmr.msra.gmra.mrb[0].mxu1 %vm438_vm1, %v414_v6 }
  0x91   : > { %1136 = vmatprep.mubr.msk.bf16.mxu0 %vm1424_vm0, %v1423_v0  ;;  %1142 = vmatprep.mubr.msk.bf16.mxu1 %vm1424_vm0, %v1423_v0 }
 0x163   : > { %v476_v8 = vpop.f32.mrb[0].mxu0  ;;  %v542_v13 = vpop.f32.mrb[0].mxu1 }
 0x164   : > { %v477_v10 = vadd.f32 %v1078_v7, %v476_v8  ;;  %v1124_v11 = vpop.f32.mrb[1].mxu0  ;;  %v543_v16 = vadd.f32 %v1082_v9, %v542_v13  ;;  %v1132_v17 = vpop.f32.mrb[1].mxu1 }
 0x165   : > { %v479_v12 = vpop.f32.mrb[2].mxu0  ;;  %v545_v18 = vpop.f32.mrb[2].mxu1 }
 0x166   : > { %v553_v14 = vpack.c.bf16 %v477_v10, %v477_v10  ;;  %v1125_v15 = vpop.f32.mrb[3].mxu0  ;;  %v554_v19 = vpack.c.bf16 %v543_v16, %v543_v16  ;;  %v1133_v22 = vpop.f32.mrb[3].mxu1 }
 0x168   : > { %668 = vrot.lane.b32.xlu0 %v553_v14, %s1425_s25  ;;  %v560_v20 = vsel %vm555_vm2, %v553_v14, 0  ;;  %v621_v21 = vsel %vm620_vm3, %v553_v14, 0 }
 0x169   : > { %1135 = vmatpush3.bf16.xpose.msra.mxu0 %v560_v20  ;;  %1141 = vmatpush3.bf16.msra.mxu1 %v621_v21 }
 0x16a   : > { %1146 = vmatprep.subr.bf16.mxu0 %v1423_v0  ;;  %1152 = vmatprep.subr.bf16.mxu1 %v1423_v0 }
 0x16c   : > { %665 = vrot.lane.b32.xlu0 %v554_v19, %s1425_s25  ;;  %s898_s25 = scalar_lea.vmem (%p1598_p2), %s1767_s9, %s1097_s14 }
 0x170   : > { %1137 = vmatmul.mubr.msk.bf16.vlgmr.msra.gmra.mrb[4].mxu0 %vm555_vm2, %v554_v19 }
 0x171   : > { %1148 = vmatprep.mubr.msk.bf16.mxu0 %vm1424_vm0, %v1423_v0 }
 0x1da   : > { %v669_v23 = vpop.permute.xlu0 %668 }
 0x1db   : > { %v674_v24 = vsel %vm555_vm2, %v669_v23, 0  ;;  %v733_v50 = vsel %vm620_vm3, %v669_v23, 0 }
 0x1dc   : > { %1147 = vmatpush3.bf16.xpose.msra.mxu0 %v674_v24 }
 0x1dd   : > { %1158 = vmatprep.subr.bf16.mxu0 %v1423_v0 }
 0x1de   : > { %v666_v25 = vpop.permute.xlu0 %665 }
 0x1e3   : > { %1149 = vmatmul.mubr.msk.bf16.vlgmr.msra.gmra.mrb[8].mxu0 %vm555_vm2, %v666_v25 }
 0x1e4   : > { %1160 = vmatprep.mubr.msk.bf16.mxu0 %vm1424_vm0, %v1423_v0  ;;  %1159 = vmatpush3.bf16.msra.mxu0 %v1250_v51 }
 0x243   : > { %v596_v26 = vpop.f32.mrb[4].mxu0 }
 0x244   : > { %v1138_v27 = vpop.f32.mrb[5].mxu0  ;;  %v603_v28 = vsel %vm602_vm4, %v596_v26, -inf }
 0x245   : > { %604 = vmax.xlane.f32.xlu1 %v603_v28  ;;  %v599_v29 = vpop.f32.mrb[6].mxu0 }
 0x246   : > { %v1139_v30 = vpop.f32.mrb[7].mxu0 }
 0x2b6   : > { %v710_v31 = vpop.f32.mrb[8].mxu0 }
 0x2b7   : > { %v1150_v32 = vpop.f32.mrb[9].mxu0  ;;  %v716_v33 = vsel %vm602_vm4, %v710_v31, -inf }
 0x2b8   : > { %717 = vmax.xlane.f32.xlu1 %v716_v33  ;;  %v713_v34 = vpop.f32.mrb[10].mxu0 }
 0x2b9   : > { %v1151_v35 = vpop.f32.mrb[11].mxu0 }
 0x2d2   : > { %v605_v36 = vpop.xlane.xlu1 %604 }
 0x2d3   : > { %v606_v37 = vsub.f32 %v596_v26, %v605_v36 }
 0x2d5   : > { %v607_v38 = vmul.f32 1.442695, %v606_v37 }
 0x2d7   : > { %1251 = vpow2.f32 %v607_v38 }
 0x2e1   : > { %v1252_v39 = vpop.eup %1251 }
 0x2e2   : > { %v609_v40 = vsel %vm602_vm4, %v1252_v39, 0.0 }
 0x2e3   : > { %610 = vadd.xlane.f32.xlu0 %v609_v40 }
 0x345   : > { %v718_v41 = vpop.xlane.xlu1 %717 }
 0x346   : > { %v719_v42 = vsub.f32 %v710_v31, %v718_v41 }
 0x348   : > { %v720_v43 = vmul.f32 1.442695, %v719_v42 }
 0x34a   : > { %1253 = vpow2.f32 %v720_v43 }
 0x354   : > { %v1254_v44 = vpop.eup %1253 }
 0x355   : > { %v722_v45 = vsel %vm602_vm4, %v1254_v44, 0.0 }
 0x356   : > { %723 = vadd.xlane.f32.xlu1 %v722_v45 }
 0x370   : > { %v611_v46 = vpop.xlane.xlu0 %610 }
 0x371   : > { %1255 = vrcp.f32 %v611_v46 }
 0x37b   : > { %v1256_v47 = vpop.eup %1255 }
 0x37c   : > { %v613_v48 = vmul.f32 %v1256_v47, %v1252_v39 }
 0x37e   : > { %614 = vst.msk [vmem:[%s1708_s17] sm:$0x3f] %vm602_vm4, %v613_v48  ;;  %v615_v49 = vpack.c.bf16 %v613_v48, %v613_v48 }
 0x380   : > { %1143 = vmatmul.mubr.msk.bf16.vlgmr.msra.gmra.mrb[4].mxu1 %vm616_vm5, %v615_v49 }
 0x381   : > { %1153 = vmatpush3.bf16.msra.mxu1 %v733_v50  ;;  %1154 = vmatprep.mubr.msk.bf16.mxu1 %vm1424_vm0, %v1423_v0 }
 0x382   : > { %1164 = vmatprep.subr.bf16.mxu1 %v1423_v0 }
 0x385   : > { %v928_v14 = vld [vmem:[%s1708_s17] sm:$0xff] (%p1598_p2) }
 0x386   : > { %929 = vst [vmem:[%s898_s25] sm:$0xff] (%p1598_p2), %v928_v14 }
 0x3e3   : > { %v724_v52 = vpop.xlane.xlu1 %723 }
 0x3e4   : > { %1257 = vrcp.f32 %v724_v52 }
 0x3ee   : > { %v1258_v53 = vpop.eup %1257 }
 0x3ef   : > { %v726_v54 = vmul.f32 %v1258_v53, %v1254_v44 }
 0x3f1   : > { %1089 = vst.msk [vmem:[%s1708_s17 + $0x8] sm:$0x3f] %vm602_vm4, %v726_v54  ;;  %v729_v56 = vpack.c.bf16 %v726_v54, %v726_v54 }
 0x3f3   : > { %1155 = vmatmul.mubr.msk.bf16.vlgmr.msra.gmra.mrb[8].mxu1 %vm616_vm5, %v729_v56 }
 0x3f4   : > { %1165 = vmatpush3.bf16.msra.mxu1 %v1249_v55  ;;  %1166 = vmatprep.mubr.msk.bf16.mxu1 %vm1424_vm0, %v1423_v0  ;;  %v1095_v0 = vld [vmem:[%s1765_s7] ss:$0 sm:$0xff] }
 0x3f8   : > { %v930_v15 = vld [vmem:[%s1708_s17 + $0x8] sm:$0xff] (%p1598_p2) }
 0x3f9   : > { %931 = vst [vmem:[%s898_s25 + $0x10] sm:$0xff] (%p1598_p2), %v930_v15 }
 0x453   : > { %v657_v57 = vpop.f32.mrb[4].mxu1 }
 0x454   : > { %v663_v58 = vpack.c.bf16 %v657_v57, %v657_v57  ;;  %v1144_v59 = vpop.f32.mrb[5].mxu1 }
 0x455   : > { %v660_v60 = vpop.f32.mrb[6].mxu1 }
 0x456   : > { %v1145_v61 = vpop.f32.mrb[7].mxu1  ;;  %1167 = vmatmul.mubr.msk.bf16.vlgmr.msra.gmra.mrb[12].mxu1 %vm555_vm2, %v663_v58 }
 0x4c6   : > { %v769_v62 = vpop.f32.mrb[8].mxu1 }
 0x4c7   : > { %v775_v63 = vpack.c.bf16 %v769_v62, %v769_v62  ;;  %v1156_v1 = vpop.f32.mrb[9].mxu1 }
 0x4c8   : > { %v772_v2 = vpop.f32.mrb[10].mxu1 }
 0x4c9   : > { %v1157_v3 = vpop.f32.mrb[11].mxu1  ;;  %1161 = vmatmul.mubr.msk.bf16.vlgmr.msra.gmra.mrb[12].mxu0 %vm555_vm2, %v775_v63 }
 0x529   : > { %v868_v4 = vpop.f32.mrb[12].mxu1 }
 0x52a   : > { %v1168_v5 = vpop.f32.mrb[13].mxu1 }
 0x52b   : > { %v871_v6 = vpop.f32.mrb[14].mxu1 }
 0x52c   : > { %v1169_v7 = vpop.f32.mrb[15].mxu1 }
 0x59b   : > { %896 = sbr.rel (!%p1598_p2) target bundleno = 1442 (0x5a2), region = 76 }
 0x59c   : > { %v819_v8 = vpop.f32.mrb[12].mxu0 }
 0x59d   : > { %v869_v9 = vadd.f32 %v868_v4, %v819_v8  ;;  %v1162_v10 = vpop.f32.mrb[13].mxu0 }
 0x59e   : > { %v822_v11 = vpop.f32.mrb[14].mxu0 }
 0x59f   : > { %v880_v12 = vadd.f32 %v1095_v0, %v869_v9  ;;  %v1163_v13 = vpop.f32.mrb[15].mxu0 }
 0x5a1   : > { %882 = vst.msk [vmem:[%s411_s24] sm:$0x3f] %vm881_vm6, %v880_v12 }
 0x5a2 PF: > { %p22_p2 = scmp.ge.s32.totalorder %s1588_s3, 4   ;;  %s1786_s30 = smov %s1407_s10 }
 0x5a3   : > { %s1787_s10 = smov %s1411_s11  ;;  %s1788_s11 = smov %s1604_s21 }
 0x5a4   : > { %s1789_s12 = smov %s1588_s3  ;;  %24 = sbr.rel (!%p22_p2) target bundleno = 7 (0x7), region = 158 }
 0x5ab   :  { %954 = vsyncpa [#allocation3], 1 }
 0x5ac   :  { %956 = vsyncpa [#allocation3 + $0x1], 1 }
 0x5ad   :  { %957 = vsyncpa [#allocation5], 1 }
 0x5ae   :  { %958 = vsyncpa [#allocation8], 1 }

</bundles_post_ra>
